<compile_context>
chip_gen: v7x
topology: tpu7x:2x2x1
jax: 0.10.0
libtpu: 0.0.40
codegen_flags: <defaults>
</compile_context>

<pallas_src>
import jax
import jax.numpy as jnp
from jax.experimental import pallas as pl
from jax.experimental.pallas import tpu as pltpu


def _round_up(x, m):
    return (x + m - 1) // m * m


def _head_kernel(x_ref, w1t_ref, b1_ref, w2t_ref, b2_ref, o_ref):
    # x_ref:   (TN, Hp)  one row-tile of the flattened (lane-padded) input
    # w1t_ref: (Hp, Hp)  dense.weight^T, bf16, VMEM-resident across the grid
    # b1_ref:  (1, Hp)   f32
    # w2t_ref: (Hp, Lp)  out_proj.weight^T, bf16, lane-padded, resident
    # b2_ref:  (1, Lp)   f32
    # o_ref:   (TN, Lp)  lane-dense output tile
    # dropout (eval mode) -> identity
    x = x_ref[...].astype(w1t_ref.dtype)          # VPU cast -> native bf16 MXU path
    h = jnp.dot(x, w1t_ref[...],
                preferred_element_type=jnp.float32) + b1_ref[...]
    h = jnp.tanh(h)                                # EUP, f32
    # dropout (eval mode) -> identity
    out = jnp.dot(h.astype(w2t_ref.dtype), w2t_ref[...],
                  preferred_element_type=jnp.float32) + b2_ref[...]
    o_ref[...] = out.astype(o_ref.dtype)


def prepare_head_params(w1, b1, w2, b2, compute_dtype=jnp.bfloat16):
    """One-time parameter prep: transpose, cast to bf16, and zero-pad both
    hidden (to a multiple of 128) and num_labels (to 128, or a multiple of
    256 when > 128) so every MXU dim is lane-dense.

    w1: (H, H) dense.weight, b1: (H,), w2: (L, H) out_proj.weight, b2: (L,).
    Returns (w1t, b1r, w2t, b2r, num_labels).
    """
    hidden = w1.shape[1]
    num_labels = w2.shape[0]
    hp = _round_up(hidden, 128)
    if num_labels <= 128:
        l_pad = 128
    else:
        l_pad = _round_up(num_labels, 256)   # 256-wide MXU on v6e/v7x

    w1t = jnp.zeros((hp, hp), dtype=compute_dtype)
    w1t = w1t.at[:hidden, :hidden].set(jnp.asarray(w1, dtype=compute_dtype).T)
    b1r = jnp.zeros((1, hp), dtype=jnp.float32)
    b1r = b1r.at[:, :hidden].set(jnp.asarray(b1, dtype=jnp.float32).reshape(1, hidden))

    w2t = jnp.zeros((hp, l_pad), dtype=compute_dtype)
    w2t = w2t.at[:hidden, :num_labels].set(jnp.asarray(w2, dtype=compute_dtype).T)
    b2r = jnp.zeros((1, l_pad), dtype=jnp.float32)
    b2r = b2r.at[:, :num_labels].set(
        jnp.asarray(b2, dtype=jnp.float32).reshape(1, num_labels))
    return w1t, b1r, w2t, b2r, num_labels


def model_head_forward(features, w1t, b1r, w2t, b2r, num_labels, row_tile=512):
    """features: (B, S, H) or (..., H). Params from prepare_head_params."""
    orig_shape = features.shape
    hidden = orig_shape[-1]
    hp = w1t.shape[0]
    l_pad = w2t.shape[1]

    x2d = features.reshape(-1, hidden)
    n = x2d.shape[0]
    if hp != hidden:
        # Only when H is not already 128-aligned: lane-pad the contraction dim.
        x2d = jnp.pad(x2d, ((0, 0), (0, hp - hidden)))

    # Row tile: multiple of 8, capped at `row_tile`.  No N padding -- the grid
    # uses cdiv and Pallas masks the partial last block.  Guarantee >= 2 grid
    # steps when possible so v7x megacore can shard the "parallel" axis.
    tn = min(row_tile, _round_up(n, 8))
    if pl.cdiv(n, tn) < 2 and n > 8:
        tn = _round_up((n + 1) // 2, 8)
    grid = (pl.cdiv(n, tn),)

    itemsize = jnp.dtype(features.dtype).itemsize
    cost = pl.CostEstimate(
        flops=2 * n * (hp * hp + hp * l_pad),
        transcendentals=n * hp,
        bytes_accessed=(x2d.size * jnp.dtype(x2d.dtype).itemsize
                        + w1t.size * jnp.dtype(w1t.dtype).itemsize
                        + w2t.size * jnp.dtype(w2t.dtype).itemsize
                        + (b1r.size + b2r.size) * 4
                        + n * l_pad * itemsize),
    )

    out2d = pl.pallas_call(
        _head_kernel,
        out_shape=jax.ShapeDtypeStruct((n, l_pad), features.dtype),
        grid=grid,
        in_specs=[
            pl.BlockSpec((tn, hp), lambda i: (i, 0)),         # X: tiled over N
            pl.BlockSpec((hp, hp), lambda i: (0, 0)),         # W1^T: resident
            pl.BlockSpec((1, hp), lambda i: (0, 0)),          # b1:   resident
            pl.BlockSpec((hp, l_pad), lambda i: (0, 0)),      # W2^T: resident
            pl.BlockSpec((1, l_pad), lambda i: (0, 0)),       # b2:   resident
        ],
        out_specs=pl.BlockSpec((tn, l_pad), lambda i: (i, 0)),
        compiler_params=pltpu.CompilerParams(
            # Single N axis is fully parallel -> megacore sharding on v7x.
            dimension_semantics=("parallel",),
            # Explicit scoped-VMEM limit (v5e default is only 16 MiB); the
            # double-buffered (tn, Hp) tiles + bf16 resident weights stay well
            # under 32 MiB on v5e/v6e/v7x for wav2vec2-scale H.
            vmem_limit_bytes=32 * 1024 * 1024,
        ),
        cost_estimate=cost,
    )(x2d, w1t, b1r, w2t, b2r)

    out2d = out2d[:, :num_labels]
    return out2d.reshape(orig_shape[:-1] + (num_labels,))


if __name__ == "__main__":
    # Small shapes consistent with the module: batch=2, seq=8, hidden=32, labels=4.
    B, S, H, L = 2, 8, 32, 4

    key = jax.random.PRNGKey(0)
    k_x, k_w1, k_b1, k_w2, k_b2 = jax.random.split(key, 5)

    features = jax.random.normal(k_x, (B, S, H), dtype=jnp.float32)

    # nn.Linear shapes: weight (out, in), bias (out,).
    w1 = jax.random.normal(k_w1, (H, H), dtype=jnp.float32) * 0.05
    b1 = jax.random.normal(k_b1, (H,), dtype=jnp.float32) * 0.01
    w2 = jax.random.normal(k_w2, (L, H), dtype=jnp.float32) * 0.05
    b2 = jax.random.normal(k_b2, (L,), dtype=jnp.float32) * 0.01

    # One-time parameter preparation (transpose + bf16 cast + lane padding).
    w1t, b1r, w2t, b2r, num_labels = prepare_head_params(w1, b1, w2, b2)

    out = model_head_forward(features, w1t, b1r, w2t, b2r, num_labels)
    jax.block_until_ready(out)

    # Reference in plain f32 JAX (eval mode: dropout == identity).  bf16 MXU
    # operands with f32 accumulation -> compare with a looser tolerance.
    ref = jnp.tanh(features @ w1.T + b1) @ w2.T + b2
    assert out.shape == (B, S, L)
    assert jnp.allclose(out, ref, atol=1e-2, rtol=1e-2), (
        float(jnp.max(jnp.abs(out - ref))))

    print("KERNEL_OK")
</pallas_src>

<mosaic_0001>
module attributes {stable_mosaic.version = 11 : i64} {
  func.func @_head_kernel(%arg0: i32, %arg1: memref<8x128xf32, #tpu.memory_space<vmem>>, %arg2: memref<128x128xbf16, #tpu.memory_space<vmem>>, %arg3: memref<1x128xf32, #tpu.memory_space<vmem>>, %arg4: memref<128x128xbf16, #tpu.memory_space<vmem>>, %arg5: memref<1x128xf32, #tpu.memory_space<vmem>>, %arg6: memref<8x128xf32, #tpu.memory_space<vmem>>) attributes {dimension_semantics = [#tpu.dimension_semantics<parallel>], iteration_bounds = array<i64: 2>, scalar_prefetch = 0 : i64, scratch_operands = 0 : i64, tpu.core_type = #tpu.core_type<tc>, window_params = [{transform_indices = @transform_0, window_bounds = array<i64: 8, 128>}, {pipeline_mode = #tpu.pipeline_mode<synchronous>, transform_indices = @transform_1, window_bounds = array<i64: 128, 128>}, {pipeline_mode = #tpu.pipeline_mode<synchronous>, transform_indices = @transform_2, window_bounds = array<i64: 1, 128>}, {pipeline_mode = #tpu.pipeline_mode<synchronous>, transform_indices = @transform_3, window_bounds = array<i64: 128, 128>}, {pipeline_mode = #tpu.pipeline_mode<synchronous>, transform_indices = @transform_4, window_bounds = array<i64: 1, 128>}, {transform_indices = @transform_5, window_bounds = array<i64: 8, 128>}]} {
    %c0 = arith.constant 0 : index
    %c0_0 = arith.constant 0 : index
    %0 = vector.load %arg1[%c0, %c0_0] : memref<8x128xf32, #tpu.memory_space<vmem>>, vector<8x128xf32>
    %1 = arith.truncf %0 : vector<8x128xf32> to vector<8x128xbf16>
    %c0_1 = arith.constant 0 : index
    %c0_2 = arith.constant 0 : index
    %2 = vector.load %arg2[%c0_1, %c0_2] : memref<128x128xbf16, #tpu.memory_space<vmem>>, vector<128x128xbf16>
    %cst = arith.constant dense<0.000000e+00> : vector<8x128xf32>
    %3 = tpu.matmul %1, %2, %cst {dimension_numbers = #tpu.dot_dimension_numbers<[1], [0], [0], [1], [0, 0, 1, 1], [], []>} : vector<8x128xbf16>, vector<128x128xbf16>, vector<8x128xf32> -> vector<8x128xf32>
    %c0_3 = arith.constant 0 : index
    %c0_4 = arith.constant 0 : index
    %4 = vector.load %arg3[%c0_3, %c0_4] : memref<1x128xf32, #tpu.memory_space<vmem>>, vector<1x128xf32>
    %5 = vector.broadcast %4 : vector<1x128xf32> to vector<8x128xf32>
    %6 = arith.addf %3, %5 : vector<8x128xf32>
    %7 = math.tanh %6 : vector<8x128xf32>
    %8 = arith.truncf %7 : vector<8x128xf32> to vector<8x128xbf16>
    %c0_5 = arith.constant 0 : index
    %c0_6 = arith.constant 0 : index
    %9 = vector.load %arg4[%c0_5, %c0_6] : memref<128x128xbf16, #tpu.memory_space<vmem>>, vector<128x128xbf16>
    %cst_7 = arith.constant dense<0.000000e+00> : vector<8x128xf32>
    %10 = tpu.matmul %8, %9, %cst_7 {dimension_numbers = #tpu.dot_dimension_numbers<[1], [0], [0], [1], [0, 0, 1, 1], [], []>} : vector<8x128xbf16>, vector<128x128xbf16>, vector<8x128xf32> -> vector<8x128xf32>
    %c0_8 = arith.constant 0 : index
    %c0_9 = arith.constant 0 : index
    %11 = vector.load %arg5[%c0_8, %c0_9] : memref<1x128xf32, #tpu.memory_space<vmem>>, vector<1x128xf32>
    %12 = vector.broadcast %11 : vector<1x128xf32> to vector<8x128xf32>
    %13 = arith.addf %10, %12 : vector<8x128xf32>
    %c0_10 = arith.constant 0 : index
    %c0_11 = arith.constant 0 : index
    %14 = vector.load %arg6[%c0_10, %c0_11] : memref<8x128xf32, #tpu.memory_space<vmem>>, vector<8x128xf32>
    tpu.vector_store %arg6[%c0_10, %c0_11], %13 {strides = array<i32>} : memref<8x128xf32, #tpu.memory_space<vmem>>, vector<8x128xf32>,
    return
  }
  func.func @transform_0(%arg0: i32) -> (i32, i32) {
    %c0_i32 = arith.constant 0 : i32
    %c0_i32_0 = arith.constant 0 : i32
    return %arg0, %c0_i32 : i32, i32
  }
  func.func @transform_1(%arg0: i32) -> (i32, i32) {
    %c0_i32 = arith.constant 0 : i32
    %c0_i32_0 = arith.constant 0 : i32
    %c0_i32_1 = arith.constant 0 : i32
    return %c0_i32, %c0_i32_0 : i32, i32
  }
  func.func @transform_2(%arg0: i32) -> (i32, i32) {
    %c0_i32 = arith.constant 0 : i32
    %c0_i32_0 = arith.constant 0 : i32
    %c0_i32_1 = arith.constant 0 : i32
    return %c0_i32, %c0_i32_0 : i32, i32
  }
  func.func @transform_3(%arg0: i32) -> (i32, i32) {
    %c0_i32 = arith.constant 0 : i32
    %c0_i32_0 = arith.constant 0 : i32
    %c0_i32_1 = arith.constant 0 : i32
    return %c0_i32, %c0_i32_0 : i32, i32
  }
  func.func @transform_4(%arg0: i32) -> (i32, i32) {
    %c0_i32 = arith.constant 0 : i32
    %c0_i32_0 = arith.constant 0 : i32
    %c0_i32_1 = arith.constant 0 : i32
    return %c0_i32, %c0_i32_0 : i32, i32
  }
  func.func @transform_5(%arg0: i32) -> (i32, i32) {
    %c0_i32 = arith.constant 0 : i32
    %c0_i32_0 = arith.constant 0 : i32
    return %arg0, %c0_i32 : i32, i32
  }
}

</mosaic_0001>

<bundles_post_ra>
// kernel: tpu_custom_call.1
= control target key start
LH: loop header
LB: loop body
LE: loop exit
PB: predicated region body
PF: predicated region fallthrough
CT: control target
= control target key end

     0   :  { %10 = vsyncpa [#allocation3], 0  ;;  %s1219_s0 = inlined_call_operand.hbm [shape: f32[16,128], index: 0, kind: input, shape index: {}]   ;;  %s1220_s1 = inlined_call_operand.hbm [shape: bf16[128,128], index: 1, kind: input, shape index: {}]   ;;  %s1221_s2 = inlined_call_operand.vmem [shape: f32[1,128], index: 2, kind: input, shape index: {}]   ;;  %s1222_s3 = inlined_call_operand.hbm [shape: bf16[128,128], index: 3, kind: input, shape index: {}]   ;;  %s1223_s4 = inlined_call_operand.vmem [shape: f32[1,128], index: 4, kind: input, shape index: {}]   ;;  %s1224_s5 = inlined_call_operand.hbm [shape: f32[16,128], index: 5, kind: output, shape index: {}]  }
   0x1   :  { %12 = vsyncpa [#allocation3 + $0x1], 0 }
   0x2   :  { %13 = vsyncpa [#allocation6], 0 }
   0x3   :  { %14 = vsyncpa [#allocation4], 0 }
   0x4   :  { %16 = vsyncpa [#allocation4 + $0x1], 0  ;;  %s977_s18 = smov 0   ;;  %s979_s19 = smov 0  }
   0x5   :  { %s981_s20 = smov 0   ;;  %s983_s21 = smov 0  }
   0x6 LB: > { %s998_s22 = sadd.s32 4294967295, %s937_s21   ;;  %s600_s23 = sadd.s32 4294967294, %s937_s21   ;;  %s937_s21 = sphi %s983_s21, %s1244_s21   ;;  %s933_s20 = sphi %s981_s20, %s1243_s20   ;;  %s929_s19 = sphi %s979_s19, %s1242_s19   ;;  %s925_s18 = sphi %s977_s18, %s1241_s18  }
   0x7   : > { %p42_p0 = scmp.ne.s32.totalorder %s929_s19, %s925_s18  ;;  %p1225_p1 = scmp.eq.s32.totalorder %s998_s22, 0 }
   0x8   : > { %p156_p3 = scmp.eq.s32.totalorder %s600_s23, 1  ;;  %p601_p5 = scmp.ge.s32.totalorder %s937_s21, 1 }
   0x9   : > { %p1007_p4 = por %p1225_p1, %p42_p0  ;;  %p163_p7 = scmp.lt.s32.totalorder %s937_s21, 3 }
   0xa   : > { %p1012_p6 = por %p156_p3, %p42_p0  ;;  %s939_s27 = smov [#allocation5]  }
   0xb   : > { %s1228_s24 = scalar_select %p1007_p4, 1, 0 }
   0xc   : > { %s1229_s25 = scalar_select %p1012_p6, 1, 0 }
   0xd   : > { %p1017_p8 = pnand %p601_p5, %p163_p7  ;;  %s175_s28 = sshll.u32 %s939_s27, 4  ;;  %s1021_s28 = int_to_ptr.vmem [resolvable:$true] %s175_s28 }
   0xe   : > { %s940_s30 = smov [#allocation7]   ;;  %s781_s9 = scalar_lea.hbm %s1220_s1, 1024 }
   0xf   : > { %p704_p9 = pneg %p1017_p8  ;;  %s191_s6 = sshll.u32 %s940_s30, 4  ;;  %s1032_s6 = int_to_ptr.vmem [resolvable:$true] %s191_s6 }
  0x10   : > { %p782_p12 = scmp.ne.s32.totalorder %s1220_s1, %s781_s9  ;;  %p788_p5 = scmp.lt.u32.totalorder %s781_s9, %s1220_s1 }
  0x11   : > { %p1028_p11 = pnand %p704_p9, %p1225_p1 }
  0x13   : > { %p783_p13 = pneg %p1028_p11 }
  0x15   : > { %p784_p0 = pnand %p783_p13, %p782_p12 }
  0x17   : > { %p785_p3 = pneg %p784_p0 }
  0x19   : > { %p790_p7 = pnand %p788_p5, %p785_p3 }
  0x1b   : > { %793 = shalt.err (!%p790_p7)
}
  0x1c   : > { %s794_s14 = scalar_lea.vmem %s1021_s28, 1024  ;;  %p802_p2 = scmp.lt.s32.totalorder %s1021_s28, %s1021_s28 }
  0x1d   : > { %p795_p9 = scmp.ne.s32.totalorder %s1021_s28, %s794_s14  ;;  %p803_p12 = scmp.lt.s32.totalorder %s794_s14, %s794_s14 }
  0x1f   : > { %p797_p10 = pnand %p795_p9, %p783_p13  ;;  %p804_p0 = por %p803_p12, %p802_p2 }
  0x21   : > { %p798_p1 = pneg %p797_p10 }
  0x23   : > { %p805_p6 = pnand %p804_p0, %p798_p1 }
  0x25   : > { %808 = shalt.err (!%p805_p6)
}
  0x26   : > { %s941_s15 = smov 64   ;;  %s942_s16 = smov 4  }
  0x27   : > { %707 = dma.hbm_to_vmem [thread:$0]  (!%p1028_p11), %s1220_s1, 1024, %s1021_s28, [#allocation6], %s941_s15, %s941_s15, %s942_s16  }
  0x28   : > { %s809_s7 = scalar_lea.hbm %s1222_s3, 1024 }
  0x29   : > { %p810_p2 = scmp.ne.s32.totalorder %s1222_s3, %s809_s7  ;;  %p816_p10 = scmp.lt.u32.totalorder %s809_s7, %s1222_s3 }
  0x2b   : > { %p812_p1 = pnand %p810_p2, %p783_p13 }
  0x2d   : > { %p813_p6 = pneg %p812_p1 }
  0x2f   : > { %p818_p3 = pnand %p816_p10, %p813_p6 }
  0x31   : > { %821 = shalt.err (!%p818_p3)
}
  0x32   : > { %s822_s28 = scalar_lea.vmem %s1032_s6, 1024  ;;  %p830_p12 = scmp.lt.s32.totalorder %s1032_s6, %s1032_s6 }
  0x33   : > { %p823_p5 = scmp.ne.s32.totalorder %s1032_s6, %s822_s28  ;;  %p831_p0 = scmp.lt.s32.totalorder %s822_s28, %s822_s28 }
  0x35   : > { %p825_p7 = pnand %p823_p5, %p783_p13  ;;  %p832_p2 = por %p831_p0, %p830_p12 }
  0x37   : > { %p826_p9 = pneg %p825_p7 }
  0x39   : > { %p833_p1 = pnand %p832_p2, %p826_p9 }
  0x3b   : > { %836 = shalt.err (!%p833_p1)
}
  0x3c   : > { %710 = dma.hbm_to_vmem [thread:$0]  (!%p1028_p11), %s1222_s3, 1024, %s1032_s6, [#allocation6], %s941_s15, %s941_s15, %s942_s16  }
  0x3d   : > { %s1087_s14 = sadd.s32 1, %s937_s21   ;;  %s29_s29 = sadd.s32 1, %s933_s20 }
  0x3e   : > { %s26_s17 = ssub.s32 %s937_s21, %s1087_s14  ;;  %p36_p13 = scmp.ne.s32.totalorder %s933_s20, %s929_s19 }
  0x3f   : > { %p27_p6 = scmp.eq.s32.totalorder %s26_s17, 0  ;;  %p37_p10 = scmp.eq.s32.totalorder %s937_s21, 0 }
  0x40   : > { %p1232_p3 = scmp.eq.s32.totalorder %s998_s22, 1  ;;  %p721_p7 = scmp.lt.s32.totalorder %s937_s21, 2 }
  0x41   : > { %s1103_s27 = scalar_select %p27_p6, %s933_s20, %s29_s29  }
  0x42   : > { %p1097_p5 = por %p1232_p3, %p36_p13  ;;  %p38_p9 = por %p37_p10, %p36_p13 }
  0x43   : > { %s208_s30 = sand.u32 1, %s933_s20   ;;  %s606_s6 = sshll.u32 %s937_s21, 7 }
  0x44   : > { %s1233_s23 = scalar_select %p1097_p5, 1, 0 }
  0x45   : > { %s605_s7 = sshll.u32 %s208_s30, 3  ;;  %s1110_s8 = scalar_lea.hbm %s1219_s0, %s606_s6 }
  0x46   : > { %s212_s9 = scalar_lea.vmem [#allocation2], %s605_s7  ;;  %p1114_p11 = pnand %p721_p7, %p38_p9 }
  0x47   : > { %s219_s10 = sshll.u32 %s212_s9, 4  ;;  %s209_s28 = scalar_lea.sflag [#allocation3], %s208_s30  ;;  %s1112_s10 = int_to_ptr.vmem [resolvable:$true] %s219_s10 }
  0x48   : > { %s837_s12 = scalar_lea.hbm %s1110_s8, 128  ;;  %p839_p0 = pneg %p1114_p11 }
  0x49   : > { %p838_p12 = scmp.ne.s32.totalorder %s1110_s8, %s837_s12  ;;  %s842_s17 = scalar_lea.hbm %s1219_s0, 256 }
  0x4a   : > { %p843_p13 = scmp.lt.u32.totalorder %s1110_s8, %s1219_s0  ;;  %p844_p6 = scmp.lt.u32.totalorder %s842_s17, %s837_s12 }
  0x4b   : > { %p840_p2 = pnand %p839_p0, %p838_p12  ;;  %p846_p3 = scmp.lt.u32.totalorder %s837_s12, %s1110_s8 }
  0x4c   : > { %p845_p10 = por %p844_p6, %p843_p13 }
  0x4d   : > { %p841_p1 = pneg %p840_p2 }
  0x4e   : > { %p847_p7 = por %p846_p3, %p845_p10 }
  0x50   : > { %p848_p9 = pnand %p847_p7, %p841_p1 }
  0x52   : > { %851 = shalt.err (!%p848_p9)
}
  0x53   : > { %s852_s30 = scalar_lea.vmem %s1112_s10, 128  ;;  %s943_s15 = smov [#allocation2]  }
  0x54   : > { %p853_p12 = scmp.ne.s32.totalorder %s1112_s10, %s852_s30  ;;  %s857_s16 = sshll.u32 %s943_s15, 4  ;;  %s858_s16 = int_to_ptr.vmem [resolvable:$false] %s857_s16 }
  0x55   : > { %s859_s9 = scalar_lea.vmem %s858_s16, 256  ;;  %p860_p4 = scmp.lt.s32.totalorder %s1112_s10, %s858_s16 }
  0x56   : > { %p855_p2 = pnand %p853_p12, %p839_p0  ;;  %p861_p13 = scmp.lt.s32.totalorder %s859_s9, %s852_s30 }
  0x58   : > { %p856_p5 = pneg %p855_p2  ;;  %p862_p6 = por %p861_p13, %p860_p4 }
  0x5a   : > { %p863_p10 = pnand %p862_p6, %p856_p5 }
  0x5c   : > { %866 = shalt.err (!%p863_p10)
}
  0x5d   : > { %714 = dma.hbm_to_vmem [thread:$0]  (!%p1114_p11), %s1110_s8, 128, %s1112_s10, %s209_s28  }
  0x5e   : > { %228 = sbr.rel (%p1017_p8) target bundleno = 594 (0x252), region = 40  ;;  %s1146_s12 = sand.u32 (!%p1017_p8), 1, %s929_s19  }
  0x5f   : > { %s608_s13 = sshll.u32 (!%p1017_p8), %s1146_s12, 3  ;;  %s231_s29 = scalar_lea.sflag (!%p1017_p8), [#allocation3], %s1146_s12 }
  0x60   : > { %s1152_s17 = scalar_lea.vmem (!%p1017_p8), [#allocation2], %s608_s13  ;;  %p1235_p4 = scmp.ne.s32.totalorder (!%p1017_p8), %s1228_s24, 0 }
  0x65   : > { %912 = dma.done.wait (%p1235_p4), %s231_s29, 128  }
  0x66   : > { %914 = vsyncadd (%p1235_p4), %s231_s29, 4294967168  ;;  %p1236_p5 = scmp.eq.s32.totalorder %s998_s22, 0 }
  0x68   : > { %916 = dma.done.wait (%p1236_p5), [#allocation6], 2048   ;;  %p1237_p8 = pmov %p1236_p5 }
  0x69   : > { %v944_v0 = vmov 0.0   ;;  %vm945_vm0 = vmmov 0   ;;  %v763_v1 = vld [vmem:[#allocation5] sm:$0xff]   ;;  %v764_v2 = vld [vmem:[#allocation5 + $0x8] sm:$0xff]   ;;  %v765_v3 = vld [vmem:[#allocation5 + $0x10] sm:$0xff]   ;;  %s631_s11 = sshll.u32 %s998_s22, 7 }
  0x6a   : > { %918 = vsyncadd (%p1237_p8), [#allocation6], 4294965248  ;;  %652 = vmatprep.subr.bf16.mxu0 %v944_v0  ;;  %668 = vmatprep.mubr.msk.bf16.mxu0 %vm945_vm0, %v944_v0  ;;  %v771_v4 = vld [vmem:[#allocation7] sm:$0xff]   ;;  %v766_v5 = vld [vmem:[#allocation5 + $0x18] sm:$0xff]   ;;  %s268_s28 = scalar_lea.vmem [#allocation8], %s608_s13  ;;  %s1175_s15 = scalar_lea.hbm %s1224_s5, %s631_s11 }
  0x6b   : > { %672 = vmatprep.subr.bf16.mxu1 %v944_v0  ;;  %688 = vmatprep.mubr.msk.bf16.mxu1 %vm945_vm0, %v944_v0  ;;  %v772_v6 = vld [vmem:[#allocation7 + $0x8] sm:$0xff]   ;;  %v767_v7 = vld [vmem:[#allocation5 + $0x20] sm:$0xff]   ;;  %v773_v8 = vld [vmem:[#allocation7 + $0x10] sm:$0xff]   ;;  %s511_s7 = sshll.u32 %s268_s28, 4  ;;  %s498_s22 = scalar_lea.sflag [#allocation4], %s1146_s12  ;;  %s1177_s7 = int_to_ptr.vmem [resolvable:$true] %s511_s7 }
  0x6c   : > { %653 = vmatpush3.bf16.msra.mxu0 %v763_v1  ;;  %673 = vmatpush3.bf16.msra.mxu1 %v771_v4  ;;  %v768_v9 = vld [vmem:[#allocation5 + $0x28] sm:$0xff]   ;;  %v774_v10 = vld [vmem:[#allocation7 + $0x18] sm:$0xff]   ;;  %v769_v11 = vld [vmem:[#allocation5 + $0x30] sm:$0xff]   ;;  %s867_s16 = scalar_lea.vmem %s1177_s7, 128  ;;  %p1238_p0 = scmp.ne.s32.totalorder %s1233_s23, 0 }
  0x6d   : > { %654 = vmatprep.subr.bf16.mxu0 %v944_v0  ;;  %674 = vmatprep.subr.bf16.mxu1 %v944_v0  ;;  %v770_v12 = vld [vmem:[#allocation5 + $0x38] sm:$0xff]   ;;  %v775_v15 = vld [vmem:[#allocation7 + $0x20] sm:$0xff]   ;;  %v776_v16 = vld [vmem:[#allocation7 + $0x28] sm:$0xff]   ;;  %p868_p11 = scmp.ne.s32.totalorder %s1177_s7, %s867_s16  ;;  %s946_s9 = smov [#allocation8]  }
  0x6e   : > { %v270_v13 = vld [vmem:[%s1152_s17] sm:$0xff]  ;;  %s871_s13 = sshll.u32 %s946_s9, 4  ;;  %s872_s13 = int_to_ptr.vmem [resolvable:$false] %s871_s13 }
  0x6f   : > { %v271_v14 = vpack.c.bf16 %v270_v13, %v270_v13  ;;  %v777_v17 = vld [vmem:[#allocation7 + $0x30] sm:$0xff]   ;;  %v778_v18 = vld [vmem:[#allocation7 + $0x38] sm:$0xff]   ;;  %p869_p1 = pnand %p868_p11, %p1238_p0  ;;  %s873_s29 = scalar_lea.vmem %s872_s13, 256 }
  0x70   : > { %655 = vmatpush3.bf16.msra.mxu0 %v764_v2  ;;  %675 = vmatpush3.bf16.msra.mxu1 %v772_v6  ;;  %v612_v19 = vld [vmem:[%s1221_s2] ss:$0 sm:$0xff]  ;;  %p874_p7 = scmp.lt.s32.totalorder %s1177_s7, %s872_s13  ;;  %p875_p9 = scmp.lt.s32.totalorder %s873_s29, %s867_s16 }
  0x71   : > { %656 = vmatprep.subr.bf16.mxu0 %v944_v0  ;;  %676 = vmatprep.subr.bf16.mxu1 %v944_v0  ;;  %v621_v27 = vld [vmem:[%s1223_s4] ss:$0 sm:$0xff]  ;;  %p870_p3 = pneg %p869_p1 }
  0x72   : > { %p876_p12 = por %p875_p9, %p874_p7 }
  0x74   : > { %657 = vmatpush3.bf16.msra.mxu0 %v765_v3  ;;  %677 = vmatpush3.bf16.msra.mxu1 %v773_v8  ;;  %p877_p2 = pnand %p876_p12, %p870_p3 }
  0x75   : > { %658 = vmatprep.subr.bf16.mxu0 %v944_v0  ;;  %678 = vmatprep.subr.bf16.mxu1 %v944_v0 }
  0x78   : > { %659 = vmatpush3.bf16.msra.mxu0 %v766_v5  ;;  %679 = vmatpush3.bf16.msra.mxu1 %v774_v10 }
  0x79   : > { %660 = vmatprep.subr.bf16.mxu0 %v944_v0  ;;  %680 = vmatprep.subr.bf16.mxu1 %v944_v0 }
  0x7c   : > { %661 = vmatpush3.bf16.msra.mxu0 %v767_v7  ;;  %681 = vmatpush3.bf16.msra.mxu1 %v775_v15 }
  0x7d   : > { %662 = vmatprep.subr.bf16.mxu0 %v944_v0  ;;  %682 = vmatprep.subr.bf16.mxu1 %v944_v0 }
  0x80   : > { %663 = vmatpush3.bf16.msra.mxu0 %v768_v9  ;;  %683 = vmatpush3.bf16.msra.mxu1 %v776_v16 }
  0x81   : > { %664 = vmatprep.subr.bf16.mxu0 %v944_v0  ;;  %684 = vmatprep.subr.bf16.mxu1 %v944_v0 }
  0x84   : > { %665 = vmatpush3.bf16.msra.mxu0 %v769_v11  ;;  %685 = vmatpush3.bf16.msra.mxu1 %v777_v17 }
  0x85   : > { %666 = vmatprep.subr.bf16.mxu0 %v944_v0  ;;  %686 = vmatprep.subr.bf16.mxu1 %v944_v0 }
  0x88   : > { %667 = vmatpush3.bf16.msra.mxu0 %v770_v12  ;;  %687 = vmatpush3.bf16.msra.mxu1 %v778_v18 }
  0x8b   : > { %669 = vmatmul.mubr.bf16.vlgmr.msra.gmra.mrb[0].mxu0 %v271_v14 }
 0x15e   : > { %v377_v20 = vpop.f32.mrb[0].mxu0 }
 0x15f   : > { %v378_v21 = vadd.f32 %v612_v19, %v377_v20  ;;  %v670_v22 = vpop.f32.mrb[1].mxu0 }
 0x160   : > { %v380_v23 = vpop.f32.mrb[2].mxu0 }
 0x161   : > { %779 = vtanh.f32 %v378_v21  ;;  %v671_v24 = vpop.f32.mrb[3].mxu0 }
 0x16b   : > { %v780_v25 = vpop.eup %779 }
 0x16c   : > { %v384_v26 = vpack.c.bf16 %v780_v25, %v780_v25 }
 0x16e   : > { %689 = vmatmul.mubr.bf16.vlgmr.msra.gmra.mrb[0].mxu1 %v384_v26 }
 0x241   : > { %v490_v28 = vpop.f32.mrb[0].mxu1 }
 0x242   : > { %v491_v29 = vadd.f32 %v621_v27, %v490_v28  ;;  %v690_v30 = vpop.f32.mrb[1].mxu1 }
 0x243   : > { %v493_v31 = vpop.f32.mrb[2].mxu1 }
 0x244   : > { %496 = vst [vmem:[%s268_s28] sm:$0xff] %v491_v29  ;;  %v691_v32 = vpop.f32.mrb[3].mxu1 }
 0x245   : > { %880 = shalt.err (!%p877_p2)
}
 0x246   : > { %s881_s12 = scalar_lea.hbm %s1175_s15, 128  ;;  %s885_s26 = scalar_lea.hbm %s1224_s5, 256 }
 0x247   : > { %p882_p13 = scmp.ne.s32.totalorder %s1175_s15, %s881_s12  ;;  %p886_p4 = scmp.lt.u32.totalorder %s1175_s15, %s1224_s5 }
 0x248   : > { %p887_p5 = scmp.lt.u32.totalorder %s885_s26, %s881_s12  ;;  %p889_p11 = scmp.lt.u32.totalorder %s881_s12, %s1175_s15 }
 0x249   : > { %p883_p6 = pnand %p882_p13, %p1238_p0 }
 0x24a   : > { %p888_p8 = por %p887_p5, %p886_p4 }
 0x24b   : > { %p884_p10 = pneg %p883_p6 }
 0x24c   : > { %p890_p1 = por %p889_p11, %p888_p8 }
 0x24e   : > { %p891_p3 = pnand %p890_p1, %p884_p10 }
 0x250   : > { %894 = shalt.err (!%p891_p3)
}
 0x251   : > { %702 = dma.vmem_to_hbm [thread:$0]  (%p1238_p0), %s1177_s7, 128, %s1175_s15, %s498_s22  }
 0x252 PF: > { %s523_s11 = sand.u32 1, %s925_s18   ;;  %p1239_p7 = scmp.ne.s32.totalorder %s1229_s25, 0 }
 0x253   : > { %p1240_p9 = scmp.ge.s32.totalorder %s937_s21, 2  ;;  %s524_s28 = scalar_lea.sflag [#allocation4], %s523_s11 }
 0x255   : > { %p716_p12 = pnand %p1240_p9, %p1239_p7 }
 0x257   : > { %920 = dma.done.wait (!%p716_p12), %s524_s28, 128  }
 0x258   : > { %922 = vsyncadd (!%p716_p12), %s524_s28, 4294967168  ;;  %p19_p2 = scmp.ge.s32.totalorder %s1087_s14, 4   ;;  %s1241_s18 = smov %s929_s19 }
 0x259   : > { %s1242_s19 = smov %s933_s20  ;;  %s1243_s20 = smov %s1103_s27 }
 0x25a   : > { %s1244_s21 = smov %s1087_s14  ;;  %21 = sbr.rel (!%p19_p2) target bundleno = 6 (0x6), region = 93 }
 0x261   :  { %529 = vsyncpa [#allocation3], 1 }
 0x262   :  { %531 = vsyncpa [#allocation3 + $0x1], 1 }
 0x263   :  { %532 = vsyncpa [#allocation6], 1 }
 0x264   :  { %533 = vsyncpa [#allocation4], 1 }
 0x265   :  { %535 = vsyncpa [#allocation4 + $0x1], 1 }

</bundles_post_ra>
